<compile_context>
chip_gen: v7x
topology: tpu7x:2x2x1
jax: 0.10.0
libtpu: 0.0.40
codegen_flags: <defaults>
</compile_context>

<pallas_src>
import functools

import jax
import jax.numpy as jnp
from jax.experimental import pallas as pl
from jax.experimental.pallas import tpu as pltpu


def _pick_tile(hw, c, itemsize=4, budget_bytes=2 * 1024 * 1024, max_tile=2048):
    """Largest lane tile (multiple of 128, dividing hw) with a (C, tile) block <= budget."""
    cap = (budget_bytes // max(c * itemsize, 1)) // 128 * 128
    cap = max(128, min(cap, max_tile))
    if hw <= cap:
        return hw                      # full row in one block (always a legal block dim)
    t = cap
    while t >= 128:
        if hw % t == 0:
            return t
        t -= 128
    return hw                          # no 128-aligned divisor; fall back to full row


# ---------------------------------------------------------------------------
# Kernel A: streaming per-channel sum / sum-of-squares -> mean, unbiased var
# ---------------------------------------------------------------------------
def _stats_kernel(x_ref, mean_ref, var_ref, sum_acc, sq_acc, *, nchunks, lane_w, m):
    first = jnp.logical_and(pl.program_id(0) == 0, pl.program_id(1) == 0)
    last = jnp.logical_and(pl.program_id(0) == pl.num_programs(0) - 1,
                           pl.program_id(1) == pl.num_programs(1) - 1)

    @pl.when(first)
    def _():
        sum_acc[...] = jnp.zeros_like(sum_acc)
        sq_acc[...] = jnp.zeros_like(sq_acc)

    x = x_ref[...].astype(jnp.float32)          # (C, TILE)
    # Lane-parallel partial accumulation on the VPU (static 128-wide chunks);
    # the cross-lane (XLU) reduce is paid only once, at finalize.
    s = sum_acc[...]
    q = sq_acc[...]
    for k in range(nchunks):
        chunk = x[:, k * lane_w:(k + 1) * lane_w]
        s = s + chunk
        q = q + chunk * chunk
    sum_acc[...] = s
    sq_acc[...] = q

    @pl.when(last)
    def _():
        total = jnp.sum(sum_acc[...], axis=1, keepdims=True)      # (C, 1)
        total_sq = jnp.sum(sq_acc[...], axis=1, keepdims=True)    # (C, 1)
        mean = total * (1.0 / m)
        # TODO(synk): sum-of-squares variance can lose f32 precision for large-mean
        # data; switch to a shifted/Welford accumulation if that regime matters.
        var = (total_sq - m * mean * mean) * (1.0 / max(m - 1, 1))
        mean_ref[...] = mean
        var_ref[...] = var


def batch_stats(x3):
    """x3: (N, C, HW) -> per-channel (mean, unbiased var), both shape (C,), f32."""
    n, c, hw = x3.shape
    tile = _pick_tile(hw, c, jnp.dtype(x3.dtype).itemsize)
    n_tiles = hw // tile
    lane_w = 128 if (tile % 128 == 0) else tile
    nchunks = tile // lane_w
    m = n * hw

    kern = functools.partial(_stats_kernel, nchunks=nchunks, lane_w=lane_w, m=m)
    mean, var = pl.pallas_call(
        kern,
        out_shape=(
            jax.ShapeDtypeStruct((c, 1), jnp.float32),
            jax.ShapeDtypeStruct((c, 1), jnp.float32),
        ),
        grid=(n, n_tiles),
        in_specs=[pl.BlockSpec((None, c, tile), lambda i, t: (i, 0, t))],
        out_specs=(
            pl.BlockSpec((c, 1), lambda i, t: (0, 0)),
            pl.BlockSpec((c, 1), lambda i, t: (0, 0)),
        ),
        scratch_shapes=[
            pltpu.VMEM((c, lane_w), jnp.float32),
            pltpu.VMEM((c, lane_w), jnp.float32),
        ],
        compiler_params=pltpu.CompilerParams(
            dimension_semantics=("arbitrary", "arbitrary"),
            vmem_limit_bytes=32 * 1024 * 1024,
        ),
    )(x3)
    return mean[:, 0], var[:, 0]


# ---------------------------------------------------------------------------
# Kernel B: fused per-channel affine  y = x * scale + shift
# ---------------------------------------------------------------------------
def _norm_kernel(x_ref, scale_ref, shift_ref, y_ref):
    x = x_ref[...].astype(jnp.float32)          # (C, TILE)
    # TODO(synk): for bf16 activations on v6e/v7x this could stay bf16 (halves HBM
    # traffic); kept f32 compute for accuracy and v5e compatibility.
    y = x * scale_ref[...] + shift_ref[...]     # (C,1) broadcasts over lanes
    y_ref[...] = y.astype(y_ref.dtype)


def normalize_affine(x3, scale_c1, shift_c1):
    """x3: (N, C, HW); scale/shift: (C, 1) f32.  Returns y with x3's shape/dtype."""
    n, c, hw = x3.shape
    tile = _pick_tile(hw, c, jnp.dtype(x3.dtype).itemsize)
    n_tiles = hw // tile
    return pl.pallas_call(
        _norm_kernel,
        out_shape=jax.ShapeDtypeStruct((n, c, hw), x3.dtype),
        grid=(n, n_tiles),
        in_specs=[
            pl.BlockSpec((None, c, tile), lambda i, t: (i, 0, t)),
            pl.BlockSpec((c, 1), lambda i, t: (0, 0)),
            pl.BlockSpec((c, 1), lambda i, t: (0, 0)),
        ],
        out_specs=pl.BlockSpec((None, c, tile), lambda i, t: (i, 0, t)),
        compiler_params=pltpu.CompilerParams(
            dimension_semantics=("parallel", "parallel"),
            vmem_limit_bytes=32 * 1024 * 1024,
        ),
    )(x3, scale_c1, shift_c1)


# ---------------------------------------------------------------------------
# Module-level glue (parameter / buffer handling, shape plumbing)
# ---------------------------------------------------------------------------
class MovingBatchNorm2d:
    """JAX/Pallas port of MovingBatchNormNd with shape = [1, C, 1, 1] (2D conv case)."""

    def __init__(self, num_features, eps=1e-4, decay=0.1, bn_lag=0.0, affine=True):
        self.num_features = num_features
        self.eps = eps
        self.decay = decay
        self.bn_lag = bn_lag
        self.affine = affine
        # reset_parameters(): deterministic init exactly as in the reference module
        self.step = jnp.zeros((1,), jnp.float32)
        self.running_mean = jnp.zeros((num_features,), jnp.float32)
        self.running_var = jnp.ones((num_features,), jnp.float32)
        if affine:
            self.bn_weight = jnp.zeros((num_features,), jnp.float32)
            self.bn_bias = jnp.zeros((num_features,), jnp.float32)
        else:
            self.bn_weight = None
            self.bn_bias = None
        self.training = True

    def forward(self, x, logpx=None):
        # x: NCHW
        n, c, h, w = x.shape
        assert c == self.num_features
        hw = h * w
        x3 = x.reshape(n, c, hw)                      # free row-major view, no transpose

        used_mean = self.running_mean
        used_var = self.running_var

        if self.training:
            batch_mean, batch_var = batch_stats(x3)   # (C,), (C,)   Pallas streaming reduce
            if self.bn_lag > 0:
                corr = 1.0 - self.bn_lag ** (self.step[0] + 1)
                used_mean = (batch_mean - (1 - self.bn_lag) * (batch_mean - used_mean)) / corr
                used_var = (batch_var - (1 - self.bn_lag) * (batch_var - used_var)) / corr
            # running-buffer EMA update + step increment (buffer side effects; eager only)
            self.running_mean = self.running_mean - self.decay * (self.running_mean - batch_mean)
            self.running_var = self.running_var - self.decay * (self.running_var - batch_var)
            self.step = self.step + 1.0

        # per-channel scale/shift and logdet term: tiny length-C math, done in glue so the
        # Pallas inner loop is a single FMA with one lane-dense output
        used_mean = used_mean.astype(jnp.float32)
        used_var = used_var.astype(jnp.float32)
        neg_half_logvar = -0.5 * jnp.log(used_var + self.eps)     # (C,)
        inv_std = jnp.exp(neg_half_logvar)                        # matches torch formula
        if self.affine:
            scale = inv_std * jnp.exp(self.bn_weight)
            shift = self.bn_bias - used_mean * scale
            ld_c = neg_half_logvar + self.bn_weight
        else:
            scale = inv_std
            shift = -used_mean * scale
            ld_c = neg_half_logvar

        y3 = normalize_affine(x3, scale.reshape(c, 1), shift.reshape(c, 1))
        y = y3.reshape(n, c, h, w)                    # free view back to NCHW

        if logpx is None:
            return y
        # logdetgrad summed over (C, H, W) per sample; each channel term is constant over H*W
        total_ld = jnp.sum(ld_c) * hw                 # scalar, same for every sample
        return y, logpx - total_ld


# ---------------------------------------------------------------------------
# Pure-JAX reference (mirrors the PyTorch code) for a correctness check
# ---------------------------------------------------------------------------
def reference_forward(x, logpx, running_mean, running_var, weight, bias, eps):
    n, c, h, w = x.shape
    x_t = jnp.transpose(x, (1, 0, 2, 3)).reshape(c, -1)
    m = x_t.shape[1]
    batch_mean = jnp.mean(x_t, axis=1)
    batch_var = jnp.sum((x_t - batch_mean[:, None]) ** 2, axis=1) / (m - 1)
    used_mean = running_mean  # bn_lag == 0
    used_var = running_var
    um = used_mean.reshape(1, c, 1, 1)
    uv = used_var.reshape(1, c, 1, 1)
    y = (x - um) * jnp.exp(-0.5 * jnp.log(uv + eps))
    y = y * jnp.exp(weight.reshape(1, c, 1, 1)) + bias.reshape(1, c, 1, 1)
    ld = -0.5 * jnp.log(uv + eps) + weight.reshape(1, c, 1, 1)
    ld = jnp.broadcast_to(ld, x.shape).reshape(n, -1).sum(axis=1, keepdims=True)
    return y, logpx - ld, batch_mean, batch_var


if __name__ == "__main__":
    def run_case(N, C, H, W, seed):
        key = jax.random.PRNGKey(seed)
        k1, k2 = jax.random.split(key)
        x = jax.random.normal(k1, (N, C, H, W), dtype=jnp.float32) * 1.7 + 0.3
        logpx = jax.random.normal(k2, (N, 1), dtype=jnp.float32)

        bn = MovingBatchNorm2d(C, eps=1e-4, decay=0.1, bn_lag=0.0, affine=True)
        y, logpx_out = bn.forward(x, logpx)
        jax.block_until_ready(y)
        jax.block_until_ready(logpx_out)

        y_ref, logpx_ref, bm_ref, bv_ref = reference_forward(
            x, logpx,
            jnp.zeros((C,), jnp.float32), jnp.ones((C,), jnp.float32),
            jnp.zeros((C,), jnp.float32), jnp.zeros((C,), jnp.float32),
            1e-4,
        )
        rm_ref = jnp.zeros((C,)) - 0.1 * (jnp.zeros((C,)) - bm_ref)
        rv_ref = jnp.ones((C,)) - 0.1 * (jnp.ones((C,)) - bv_ref)

        assert jnp.allclose(y, y_ref, atol=1e-5, rtol=1e-5)
        assert jnp.allclose(logpx_out, logpx_ref, atol=1e-4, rtol=1e-5)
        assert jnp.allclose(bn.running_mean, rm_ref, atol=1e-5, rtol=1e-5)
        assert jnp.allclose(bn.running_var, rv_ref, atol=2e-5, rtol=1e-5)

    run_case(2, 4, 16, 16, 0)    # required small shape (single HW tile per sample)
    run_case(2, 8, 64, 64, 1)    # multi-tile grid path (HW=4096 > lane-tile cap)
    print("KERNEL_OK")
</pallas_src>

<mosaic_0001>
module attributes {stable_mosaic.version = 11 : i64} {
  func.func @_stats_kernel(%arg0: i32, %arg1: i32, %arg2: memref<1x4x256xf32, #tpu.memory_space<vmem>>, %arg3: memref<4x1xf32, #tpu.memory_space<vmem>>, %arg4: memref<4x1xf32, #tpu.memory_space<vmem>>, %arg5: memref<4x128xf32, #tpu.memory_space<vmem>>, %arg6: memref<4x128xf32, #tpu.memory_space<vmem>>) attributes {dimension_semantics = [#tpu.dimension_semantics<arbitrary>, #tpu.dimension_semantics<arbitrary>], iteration_bounds = array<i64: 2, 1>, scalar_prefetch = 0 : i64, scratch_operands = 2 : i64, tpu.core_type = #tpu.core_type<tc>, window_params = [{transform_indices = @transform_0, window_bounds = array<i64: 1, 4, 256>}, {pipeline_mode = #tpu.pipeline_mode<synchronous>, transform_indices = @transform_1, window_bounds = array<i64: 4, 1>}, {pipeline_mode = #tpu.pipeline_mode<synchronous>, transform_indices = @transform_2, window_bounds = array<i64: 4, 1>}]} {
    %c0_i32 = arith.constant 0 : i32
    %0 = arith.cmpi eq, %arg0, %c0_i32 : i32
    %c0_i32_0 = arith.constant 0 : i32
    %1 = arith.cmpi eq, %arg1, %c0_i32_0 : i32
    %2 = arith.andi %0, %1 : i1
    %c1_i32 = arith.constant 1 : i32
    %3 = arith.cmpi eq, %arg0, %c1_i32 : i32
    %c0_i32_1 = arith.constant 0 : i32
    %4 = arith.cmpi eq, %arg1, %c0_i32_1 : i32
    %5 = arith.andi %3, %4 : i1
    %6 = arith.extui %2 : i1 to i32
    %c0_i32_2 = arith.constant 0 : i32
    %7 = arith.cmpi ne, %6, %c0_i32_2 : i32
    scf.if %7 {
      %cst = arith.constant 0.000000e+00 : f32
      %24 = vector.broadcast %cst : f32 to vector<4x128xf32>
      %c0_14 = arith.constant 0 : index
      %c0_15 = arith.constant 0 : index
      %25 = vector.load %arg5[%c0_14, %c0_15] : memref<4x128xf32, #tpu.memory_space<vmem>>, vector<4x128xf32>
      tpu.vector_store %arg5[%c0_14, %c0_15], %24 {strides = array<i32>} : memref<4x128xf32, #tpu.memory_space<vmem>>, vector<4x128xf32>,
      %cst_16 = arith.constant 0.000000e+00 : f32
      %26 = vector.broadcast %cst_16 : f32 to vector<4x128xf32>
      %c0_17 = arith.constant 0 : index
      %c0_18 = arith.constant 0 : index
      %27 = vector.load %arg6[%c0_17, %c0_18] : memref<4x128xf32, #tpu.memory_space<vmem>>, vector<4x128xf32>
      tpu.vector_store %arg6[%c0_17, %c0_18], %26 {strides = array<i32>} : memref<4x128xf32, #tpu.memory_space<vmem>>, vector<4x128xf32>,
    } else {
    }
    %c0 = arith.constant 0 : index
    %c0_3 = arith.constant 0 : index
    %c0_4 = arith.constant 0 : index
    %8 = vector.load %arg2[%c0, %c0_3, %c0_4] : memref<1x4x256xf32, #tpu.memory_space<vmem>>, vector<1x4x256xf32>
    %9 = vector.shape_cast %8 : vector<1x4x256xf32> to vector<4x256xf32>
    %c0_5 = arith.constant 0 : index
    %c0_6 = arith.constant 0 : index
    %10 = vector.load %arg5[%c0_5, %c0_6] : memref<4x128xf32, #tpu.memory_space<vmem>>, vector<4x128xf32>
    %c0_7 = arith.constant 0 : index
    %c0_8 = arith.constant 0 : index
    %11 = vector.load %arg6[%c0_7, %c0_8] : memref<4x128xf32, #tpu.memory_space<vmem>>, vector<4x128xf32>
    %12 = vector.extract_strided_slice %9 {offsets = [0, 0], sizes = [4, 128], strides = [1, 1]} : vector<4x256xf32> to vector<4x128xf32>
    %13 = arith.addf %10, %12 : vector<4x128xf32>
    %14 = arith.mulf %12, %12 : vector<4x128xf32>
    %15 = arith.addf %11, %14 : vector<4x128xf32>
    %16 = vector.extract_strided_slice %9 {offsets = [0, 128], sizes = [4, 128], strides = [1, 1]} : vector<4x256xf32> to vector<4x128xf32>
    %17 = arith.addf %13, %16 : vector<4x128xf32>
    %18 = arith.mulf %16, %16 : vector<4x128xf32>
    %19 = arith.addf %15, %18 : vector<4x128xf32>
    %c0_9 = arith.constant 0 : index
    %c0_10 = arith.constant 0 : index
    %20 = vector.load %arg5[%c0_9, %c0_10] : memref<4x128xf32, #tpu.memory_space<vmem>>, vector<4x128xf32>
    tpu.vector_store %arg5[%c0_9, %c0_10], %17 {strides = array<i32>} : memref<4x128xf32, #tpu.memory_space<vmem>>, vector<4x128xf32>,
    %c0_11 = arith.constant 0 : index
    %c0_12 = arith.constant 0 : index
    %21 = vector.load %arg6[%c0_11, %c0_12] : memref<4x128xf32, #tpu.memory_space<vmem>>, vector<4x128xf32>
    tpu.vector_store %arg6[%c0_11, %c0_12], %19 {strides = array<i32>} : memref<4x128xf32, #tpu.memory_space<vmem>>, vector<4x128xf32>,
    %22 = arith.extui %5 : i1 to i32
    %c0_i32_13 = arith.constant 0 : i32
    %23 = arith.cmpi ne, %22, %c0_i32_13 : i32
    scf.if %23 {
      %c0_14 = arith.constant 0 : index
      %c0_15 = arith.constant 0 : index
      %24 = vector.load %arg5[%c0_14, %c0_15] : memref<4x128xf32, #tpu.memory_space<vmem>>, vector<4x128xf32>
      %cst = arith.constant dense<0.000000e+00> : vector<4xf32>
      %25 = vector.multi_reduction <add>, %24, %cst [1] : vector<4x128xf32> to vector<4xf32>
      %26 = vector.shape_cast %25 : vector<4xf32> to vector<4x1xf32>
      %c0_16 = arith.constant 0 : index
      %c0_17 = arith.constant 0 : index
      %27 = vector.load %arg6[%c0_16, %c0_17] : memref<4x128xf32, #tpu.memory_space<vmem>>, vector<4x128xf32>
      %cst_18 = arith.constant dense<0.000000e+00> : vector<4xf32>
      %28 = vector.multi_reduction <add>, %27, %cst_18 [1] : vector<4x128xf32> to vector<4xf32>
      %29 = vector.shape_cast %28 : vector<4xf32> to vector<4x1xf32>
      %cst_19 = arith.constant 0.001953125 : f32
      %30 = vector.broadcast %cst_19 : f32 to vector<4x1xf32>
      %31 = arith.mulf %26, %30 : vector<4x1xf32>
      %cst_20 = arith.constant 5.120000e+02 : f32
      %32 = vector.broadcast %cst_20 : f32 to vector<4x1xf32>
      %33 = arith.mulf %32, %31 : vector<4x1xf32>
      %34 = arith.mulf %33, %31 : vector<4x1xf32>
      %35 = arith.subf %29, %34 : vector<4x1xf32>
      %cst_21 = arith.constant 0.00195694715 : f32
      %36 = vector.broadcast %cst_21 : f32 to vector<4x1xf32>
      %37 = arith.mulf %35, %36 : vector<4x1xf32>
      %c0_22 = arith.constant 0 : index
      %c0_23 = arith.constant 0 : index
      %38 = vector.load %arg3[%c0_22, %c0_23] : memref<4x1xf32, #tpu.memory_space<vmem>>, vector<4x1xf32>
      tpu.vector_store %arg3[%c0_22, %c0_23], %31 {strides = array<i32>} : memref<4x1xf32, #tpu.memory_space<vmem>>, vector<4x1xf32>,
      %c0_24 = arith.constant 0 : index
      %c0_25 = arith.constant 0 : index
      %39 = vector.load %arg4[%c0_24, %c0_25] : memref<4x1xf32, #tpu.memory_space<vmem>>, vector<4x1xf32>
      tpu.vector_store %arg4[%c0_24, %c0_25], %37 {strides = array<i32>} : memref<4x1xf32, #tpu.memory_space<vmem>>, vector<4x1xf32>,
    } else {
    }
    return
  }
  func.func @transform_0(%arg0: i32, %arg1: i32) -> (i32, i32, i32) {
    %c0_i32 = arith.constant 0 : i32
    %c0_i32_0 = arith.constant 0 : i32
    return %arg0, %c0_i32, %arg1 : i32, i32, i32
  }
  func.func @transform_1(%arg0: i32, %arg1: i32) -> (i32, i32) {
    %c0_i32 = arith.constant 0 : i32
    %c0_i32_0 = arith.constant 0 : i32
    %c0_i32_1 = arith.constant 0 : i32
    return %c0_i32, %c0_i32_0 : i32, i32
  }
  func.func @transform_2(%arg0: i32, %arg1: i32) -> (i32, i32) {
    %c0_i32 = arith.constant 0 : i32
    %c0_i32_0 = arith.constant 0 : i32
    %c0_i32_1 = arith.constant 0 : i32
    return %c0_i32, %c0_i32_0 : i32, i32
  }
}

</mosaic_0001>

<bundles_post_ra>
// kernel: tpu_custom_call.1
= control target key start
LH: loop header
LB: loop body
LE: loop exit
PB: predicated region body
PF: predicated region fallthrough
CT: control target
= control target key end

     0   :  { %8 = vsyncpa [#allocation5], 0  ;;  %s566_s0 = inlined_call_operand.hbm [shape: f32[2,4,256], index: 0, kind: input, shape index: {}]   ;;  %s567_s1 = inlined_call_operand.vmem [shape: f32[4,1], index: 1, kind: output, shape index: {0}]   ;;  %s568_s2 = inlined_call_operand.vmem [shape: f32[4,1], index: 2, kind: output, shape index: {1}]  }
   0x1   :  { %10 = vsyncpa [#allocation5 + $0x1], 0  ;;  %s436_s9 = smov 0   ;;  %s438_s10 = smov 0  }
   0x2   :  { %s440_s11 = smov 0   ;;  %s442_s12 = smov 0  }
   0x3   :  { %s444_s13 = smov 0   ;;  %s446_s14 = smov 0  }
   0x4 LB: > { %s265_s15 = sadd.s32 4294967295, %s417_s14   ;;  %s28_s16 = sadd.s32 1, %s413_s13  ;;  %s417_s14 = sphi %s446_s14, %s16_s14   ;;  %s413_s13 = sphi %s444_s13, %s578_s13   ;;  %s409_s12 = sphi %s442_s12, %s577_s12   ;;  %s405_s11 = sphi %s440_s11, %s576_s11   ;;  %s401_s10 = sphi %s438_s10, %s575_s10   ;;  %s397_s9 = sphi %s436_s9, %s574_s9  }
   0x5   : > { %p30_p0 = scmp.ge.s32.totalorder %s28_s16, 2  ;;  %s37_s17 = sadd.s32 1, %s405_s11 }
   0x6   : > { %p44_p1 = scmp.ne.s32.totalorder %s405_s11, %s401_s10  ;;  %p45_p2 = scmp.eq.s32.totalorder %s417_s14, 0 }
   0x7   : > { %s580_s16 = smov (%p30_p0, %s28_s16), 0  ;;  %p50_p4 = scmp.ne.s32.totalorder %s401_s10, %s397_s9 }
   0x8   : > { %p472_p3 = por %p45_p2, %p44_p1  ;;  %s32_s19 = ssub.s32 %s413_s13, %s580_s16 }
   0x9   : > { %p51_p5 = scmp.eq.s32.totalorder %s265_s15, 0  ;;  %p35_p6 = scmp.eq.s32.totalorder %s32_s19, 0 }
   0xa   : > { %p286_p8 = scmp.lt.s32.totalorder %s417_s14, 2  ;;  %s116_s22 = sand.u32 1, %s405_s11  }
   0xb   : > { %p479_p7 = por %p51_p5, %p50_p4  ;;  %s277_s23 = sshll.u32 %s413_s13, 7 }
   0xc   : > { %s485_s21 = scalar_select %p35_p6, %s405_s11, %s37_s17  }
   0xd   : > { %s268_s24 = sshll.u32 %s116_s22, 3  ;;  %s492_s27 = scalar_lea.hbm %s566_s0, %s277_s23 }
   0xe   : > { %s120_s28 = scalar_lea.vmem [#allocation4], %s268_s24  ;;  %p496_p9 = pnand %p286_p8, %p472_p3 }
   0xf   : > { %s130_s29 = sshll.u32 %s120_s28, 4  ;;  %s117_s3 = scalar_lea.sflag [#allocation5], %s116_s22  ;;  %s500_s29 = int_to_ptr.vmem [resolvable:$true] %s130_s29 }
  0x10   : > { %s337_s4 = scalar_lea.hbm %s492_s27, 128  ;;  %p339_p13 = pneg %p496_p9 }
  0x11   : > { %p338_p12 = scmp.ne.s32.totalorder %s492_s27, %s337_s4  ;;  %s342_s7 = scalar_lea.hbm %s566_s0, 256 }
  0x12   : > { %p343_p2 = scmp.lt.u32.totalorder %s492_s27, %s566_s0  ;;  %p344_p3 = scmp.lt.u32.totalorder %s342_s7, %s337_s4 }
  0x13   : > { %p340_p0 = pnand %p339_p13, %p338_p12  ;;  %p346_p5 = scmp.lt.u32.totalorder %s337_s4, %s492_s27 }
  0x14   : > { %p345_p4 = por %p344_p3, %p343_p2 }
  0x15   : > { %p341_p1 = pneg %p340_p0 }
  0x16   : > { %p347_p6 = por %p346_p5, %p345_p4 }
  0x18   : > { %p348_p8 = pnand %p347_p6, %p341_p1 }
  0x1a   : > { %351 = shalt.err (!%p348_p8)
}
  0x1b   : > { %s352_s15 = scalar_lea.vmem %s500_s29, 128  ;;  %s419_s17 = smov [#allocation4]  }
  0x1c   : > { %p353_p12 = scmp.ne.s32.totalorder %s500_s29, %s352_s15  ;;  %s357_s18 = sshll.u32 %s419_s17, 4  ;;  %s358_s18 = int_to_ptr.vmem [resolvable:$false] %s357_s18 }
  0x1d   : > { %s359_s19 = scalar_lea.vmem %s358_s18, 256  ;;  %p360_p11 = scmp.lt.s32.totalorder %s500_s29, %s358_s18 }
  0x1e   : > { %p355_p0 = pnand %p353_p12, %p339_p13  ;;  %p361_p2 = scmp.lt.s32.totalorder %s359_s19, %s352_s15 }
  0x20   : > { %p356_p10 = pneg %p355_p0  ;;  %p362_p3 = por %p361_p2, %p360_p11 }
  0x22   : > { %p363_p4 = pnand %p362_p3, %p356_p10 }
  0x24   : > { %366 = shalt.err (!%p363_p4)
}
  0x25   : > { %285 = dma.hbm_to_vmem [thread:$0]  (!%p496_p9), %s492_s27, 128, %s500_s29, %s117_s3  }
  0x26   : > { %p572_p1 = scmp.lt.s32.totalorder %s417_s14, 3  ;;  %p573_p5 = scmp.ge.s32.totalorder %s417_s14, 1 }
  0x28   : > { %p136_p13 = pnand %p573_p5, %p572_p1 }
  0x29   : > { %s141_s22 = sand.u32 (!%p136_p13), 1, %s401_s10  }
  0x2a   : > { %139 = sbr.rel (%p136_p13) target bundleno = 226 (0xe2), region = 24  ;;  %s272_s23 = sshll.u32 (!%p136_p13), %s141_s22, 3 }
  0x2b   : > { %s142_s24 = scalar_lea.sflag (!%p136_p13), [#allocation5], %s141_s22  ;;  %s145_s25 = scalar_lea.vmem (!%p136_p13), [#allocation4], %s272_s23 }
  0x31   : > { %392 = dma.done.wait (%p479_p7), %s142_s24, 128  }
  0x32   : > { %394 = vsyncadd (%p479_p7), %s142_s24, 4294967168  ;;  %p162_p10 = scmp.eq.s32.totalorder %s409_s12, 0  ;;  %p166_p11 = scmp.eq.s32.totalorder %s409_s12, 1 }
  0x33   : > { %v420_v0 = vmov (%p162_p10), 0.0  }
  0x34   : > { %170 = sbr.rel (!%p162_p10) target bundleno = 59 (0x3b), region = 32  ;;  %171 = vst [vmem:[#allocation2] sm:$0xf] (%p162_p10), %v420_v0  ;;  %172 = vst [vmem:[#allocation3] sm:$0xf] (%p162_p10), %v420_v0 }
  0x3b PF: > { %v173_v1 = vld [vmem:[%s145_s25] sm:$0xff]  ;;  %v174_v2 = vld [vmem:[#allocation2] sm:$0xf]  ;;  %v175_v3 = vld [vmem:[#allocation3] sm:$0xf]  ;;  %vm192_vm0 = vcmask (%p166_p11), 1043456  }
  0x3c   : > { %v176_v4 = vadd.f32 %v174_v2, %v173_v1  ;;  %v180_v5 = vcombine.high %v173_v1, %v173_v1  ;;  %v177_v6 = vmul.f32 %v173_v1, %v173_v1  ;;  %v183_v7 = vrot.slane %v173_v1, 4  ;;  %190 = sbr.rel (!%p166_p11) target bundleno = 226 (0xe2), region = 36 }
  0x3d   : > { %vm205_vm1 = vcmask (%p166_p11), 3072  }
  0x3e   : > { %v182_v8 = vadd.f32 %v180_v5, %v176_v4  ;;  %v178_v9 = vadd.f32 %v177_v6, %v175_v3  ;;  %v185_v10 = vmul.f32 %v183_v7, %v183_v7 }
  0x40   : > { %187 = vst [vmem:[#allocation2] sm:$0xf] %v182_v8  ;;  %v186_v11 = vadd.f32 %v185_v10, %v178_v9 }
  0x42   : > { %188 = vst [vmem:[#allocation3] sm:$0xf] %v186_v11 }
  0x47   : > { %v191_v12 = vld [vmem:[#allocation2] sm:$0xf] }
  0x48   : > { %v193_v14 = vsel %vm192_vm0, %v191_v12, 0.0 }
  0x49   : > { %v196_v13 = vld [vmem:[#allocation3] sm:$0xf]  ;;  %194 = vadd.xlane.f32.xlu0 %v193_v14 }
  0x4a   : > { %v197_v15 = vsel %vm192_vm0, %v196_v13, 0.0 }
  0x4d   : > { %198 = vadd.xlane.f32.xlu0 %v197_v15 }
  0xd6   : > { %v195_v16 = vpop.xlane.xlu0 %194 }
  0xd7   : > { %v200_v17 = vmul.f32 0.001953125, %v195_v16 }
  0xd9   : > { %v201_v18 = vmul.f32 512.0, %v200_v17  ;;  %206 = vst.msk [vmem:[%s567_s1] sm:$0xf] %vm205_vm1, %v200_v17 }
  0xda   : > { %v199_v19 = vpop.xlane.xlu0 %198 }
  0xdb   : > { %v202_v20 = vmul.f32 %v201_v18, %v200_v17 }
  0xdd   : > { %v203_v21 = vsub.f32 %v199_v19, %v202_v20 }
  0xdf   : > { %v204_v22 = vmul.f32 0.0019569471, %v203_v21 }
  0xe1   : > { %207 = vst.msk [vmem:[%s568_s2] sm:$0xf] %vm205_vm1, %v204_v22 }
  0xe2 PF: > { %s16_s14 = sadd.s32 1, %s417_s14   ;;  %s574_s9 = smov %s401_s10 }
  0xe3   : > { %p13_p7 = scmp.ge.s32.totalorder %s16_s14, 4   ;;  %s575_s10 = smov %s405_s11 }
  0xe4   : > { %s576_s11 = smov %s485_s21  ;;  %s577_s12 = smov %s413_s13 }
  0xe5   : > { %s578_s13 = smov %s580_s16  ;;  %15 = sbr.rel (!%p13_p7) target bundleno = 4 (0x4), region = 76 }
  0xec   :  { %225 = vsyncpa [#allocation5], 1 }
  0xed   :  { %227 = vsyncpa [#allocation5 + $0x1], 1 }

</bundles_post_ra>
